<compile_context>
chip_gen: v6e
topology: v6e:2x2x1
jax: 0.10.0
libtpu: 0.0.40
codegen_flags: <defaults>
</compile_context>

<pallas_src>
import functools
import math

import jax
import jax.numpy as jnp
from jax.experimental import pallas as pl
from jax.experimental.pallas import tpu as pltpu

_INV_SQRT2 = 1.0 / math.sqrt(2.0)


def _gelu(h, approximate: bool):
    if approximate:
        # tanh-approximate GELU: the transcendental goes to the EUP (a separate
        # VLIW slot), so the nonlinearity is ~free next to the MXU matmuls.
        return jax.nn.gelu(h, approximate=True)
    # Exact erf GELU (matches torch.nn.functional.gelu default) — VPU polynomial.
    return 0.5 * h * (1.0 + jax.lax.erf(h * _INV_SQRT2))


# ---------------------------------------------------------------------------
# Kernels
# ---------------------------------------------------------------------------

def _ffn_kernel_resident(x_ref, w1_ref, b1_ref, w2_ref, b2_ref, o_ref, *, approximate):
    # x_ref: (TM, Hp)  w1_ref: (Hp, Ip)  b1_ref: (1, Ip) f32
    # w2_ref: (Ip, Hp) b2_ref: (1, Hp) f32  o_ref: (TM, Hp)
    x = x_ref[...]                                           # keep storage dtype for MXU
    h = jnp.dot(x, w1_ref[...], preferred_element_type=jnp.float32)
    h = h + b1_ref[...]                                      # bias already f32
    g = _gelu(h, approximate)
    # TODO(synk): training-mode dropout (pltpu.prng_random_bits mask) not emitted;
    # nn.Dropout is an identity at inference time.
    g = g.astype(x.dtype)                                    # narrow operand for MXU
    out = jnp.dot(g, w2_ref[...], preferred_element_type=jnp.float32)
    o_ref[...] = (out + b2_ref[...]).astype(o_ref.dtype)


def _ffn_kernel_itiled(x_ref, w1_ref, b1_ref, w2_ref, b2_ref, o_ref, acc_ref, *, approximate):
    # Grid = (row tiles, I chunks).  GELU is elementwise in I, so splitting the
    # intermediate dimension and accumulating g_chunk @ W2[chunk, :] is exact.
    k = pl.program_id(1)

    @pl.when(k == 0)
    def _():
        acc_ref[...] = jnp.zeros_like(acc_ref)

    x = x_ref[...]
    h = jnp.dot(x, w1_ref[...], preferred_element_type=jnp.float32)
    h = h + b1_ref[...]
    g = _gelu(h, approximate).astype(x.dtype)
    acc_ref[...] += jnp.dot(g, w2_ref[...], preferred_element_type=jnp.float32)

    @pl.when(k == pl.num_programs(1) - 1)
    def _():
        o_ref[...] = (acc_ref[...] + b2_ref[...]).astype(o_ref.dtype)


# ---------------------------------------------------------------------------
# Wrapper
# ---------------------------------------------------------------------------

def _round_up(v: int, m: int) -> int:
    return (v + m - 1) // m * m


def _vmem_budget_cap() -> int:
    """Usable scoped-VMEM budget for this TPU generation (bytes)."""
    try:
        cap = int(getattr(pltpu.get_tpu_info(), "vmem_capacity_bytes", 128 << 20))
    except Exception:  # very old jax / no info: assume 128 MiB-class part
        cap = 128 << 20
    # Leave ~8 MiB for Mosaic internal scratch / semaphores (matters on 64 MiB
    # v7x); never request more than ~100 MiB even on 128 MiB v5e/v6e.
    return max(min(cap - (8 << 20), 100 << 20), 16 << 20)


def _choose_tm(M: int, sublanes: int, tm_max: int) -> int:
    m_al = _round_up(M, sublanes)
    if m_al <= tm_max:
        return m_al                         # single tile, zero padded-tail waste
    # MXU-friendly candidates (multiples of 256 feed v6e/v7x 256x256 passes,
    # 128 the v5e 128x128 passes); pick the one with least padded tail,
    # preferring the larger tile on ties.
    cands = [c for c in (1024, 512, 256, 128) if c <= tm_max] or [tm_max]
    return min(cands, key=lambda c: (_round_up(M, c) - M, -c))


def _const_spec(shape, index_map):
    """BlockSpec for a grid-invariant operand: single-buffered when supported."""
    try:
        return pl.BlockSpec(shape, index_map, pipeline_mode=pl.Buffered(1))
    except Exception:
        return pl.BlockSpec(shape, index_map)


def positionwise_feed_forward(x, w1, b1, w2, b2, *, tm=None,
                              approximate_gelu=True, force_ti=None):
    """x: [B, S, H]; w1: [H, I]; b1: [I]; w2: [I, H]; b2: [H] -> [B, S, H]."""
    B, S, H = x.shape
    I = w1.shape[1]
    M = B * S

    # Lane-dense padding targets for the contraction / output feature dims.
    Hp = _round_up(H, 128)
    Ip = _round_up(I, 128)

    itemsize = jnp.dtype(x.dtype).itemsize
    sublanes = {4: 8, 2: 16, 1: 32}.get(itemsize, 8)

    cap = _vmem_budget_cap()
    if tm is None:
        tm = 512 if cap > (64 << 20) else 256   # bigger default tile on 128 MiB parts
    TM = _choose_tm(M, sublanes, int(tm))
    Mp = _round_up(M, TM)

    dt = itemsize
    tile_bytes = 2 * (2 * TM * Hp * dt)                   # x/out tiles, double-buffered
    need_res = ((2 * Hp * Ip) * dt                        # W1 + W2, single-buffered
                + (Ip + Hp) * 4                           # f32 biases
                + tile_bytes
                + TM * Ip * 4 + TM * Ip * dt              # f32 h + narrowed g
                + TM * Hp * 4                             # f32 epilogue accumulator
                + (2 << 20))                              # slack

    def _need_itiled(ti):
        return (2 * (2 * Hp * ti) * dt                    # W1/W2 chunks, double-buffered
                + 2 * ti * 4 + Hp * 4                     # b1 chunks + b2 (f32)
                + tile_bytes
                + TM * Hp * 4                             # f32 accumulator scratch
                + TM * ti * 4 + TM * ti * dt              # f32 h chunk + narrowed g chunk
                + (2 << 20))

    if force_ti is not None:
        use_itiled, TI = True, int(force_ti)
        assert TI % 128 == 0, "force_ti must be a multiple of 128"
    elif need_res > cap:
        use_itiled, TI = True, 128
        for cand in (2048, 1024, 512, 256):
            if cand <= Ip and _need_itiled(cand) <= cap:
                TI = cand
                break
    else:
        use_itiled, TI = False, None

    if use_itiled:
        Ip = _round_up(Ip, TI)      # zero pad is exact (gelu(0)=0, zero W rows/cols)

    # --- Padding / bias prep.  No-op for 128-aligned H/I (e.g. 768/3072) and it
    # constant-folds under jit; hoist outside the call when weights are reused.
    x2d = x.reshape(M, H)
    if (Mp, Hp) != (M, H):
        x2d = jnp.pad(x2d, ((0, Mp - M), (0, Hp - H)))
    w1p = jnp.pad(w1, ((0, Hp - H), (0, Ip - I))) if (Hp, Ip) != (H, I) else w1
    w2p = jnp.pad(w2, ((0, Ip - I), (0, Hp - H))) if (Hp, Ip) != (H, I) else w2
    b1p = jnp.pad(b1, (0, Ip - I)).astype(jnp.float32).reshape(1, Ip)
    b2p = jnp.pad(b2, (0, Hp - H)).astype(jnp.float32).reshape(1, Hp)

    if not use_itiled:
        vmem_limit = int(min(max(need_res, 32 << 20), cap))
        out2d = pl.pallas_call(
            functools.partial(_ffn_kernel_resident, approximate=bool(approximate_gelu)),
            out_shape=jax.ShapeDtypeStruct((Mp, Hp), x.dtype),
            grid=(Mp // TM,),
            in_specs=[
                pl.BlockSpec((TM, Hp), lambda i: (i, 0)),          # x tile
                _const_spec((Hp, Ip), lambda i: (0, 0)),           # W1 resident
                _const_spec((1, Ip), lambda i: (0, 0)),            # b1 resident (f32)
                _const_spec((Ip, Hp), lambda i: (0, 0)),           # W2 resident
                _const_spec((1, Hp), lambda i: (0, 0)),            # b2 resident (f32)
            ],
            out_specs=pl.BlockSpec((TM, Hp), lambda i: (i, 0)),
            compiler_params=pltpu.CompilerParams(
                dimension_semantics=("parallel",),
                vmem_limit_bytes=vmem_limit,
            ),
        )(x2d, w1p, b1p, w2p, b2p)
    else:
        vmem_limit = int(min(max(_need_itiled(TI), 32 << 20), cap))
        out2d = pl.pallas_call(
            functools.partial(_ffn_kernel_itiled, approximate=bool(approximate_gelu)),
            out_shape=jax.ShapeDtypeStruct((Mp, Hp), x.dtype),
            grid=(Mp // TM, Ip // TI),
            in_specs=[
                pl.BlockSpec((TM, Hp), lambda i, k: (i, 0)),       # x tile (per-i DMA only)
                pl.BlockSpec((Hp, TI), lambda i, k: (0, k)),       # W1[:, chunk]
                pl.BlockSpec((1, TI), lambda i, k: (0, k)),        # b1[chunk] (f32)
                pl.BlockSpec((TI, Hp), lambda i, k: (k, 0)),       # W2[chunk, :]
                _const_spec((1, Hp), lambda i, k: (0, 0)),         # b2 resident (f32)
            ],
            out_specs=pl.BlockSpec((TM, Hp), lambda i, k: (i, 0)),
            scratch_shapes=[pltpu.VMEM((TM, Hp), jnp.float32)],
            compiler_params=pltpu.CompilerParams(
                dimension_semantics=("parallel", "arbitrary"),
                vmem_limit_bytes=vmem_limit,
            ),
        )(x2d, w1p, b1p, w2p, b2p)

    return out2d[:M, :H].reshape(B, S, H)


def _reference(x, w1, b1, w2, b2, *, approximate):
    h = jnp.einsum("bsh,hi->bsi", x, w1) + b1
    g = _gelu(h, approximate)
    return jnp.einsum("bsi,ih->bsh", g, w2) + b2


if __name__ == "__main__":
    # Small BertConfig-like dims: hidden_size=32, intermediate_size=64.
    B, S, H, I = 2, 8, 32, 64

    key = jax.random.PRNGKey(0)
    kx, k1, kb1, k2, kb2 = jax.random.split(key, 5)

    x = jax.random.normal(kx, (B, S, H), dtype=jnp.float32)
    # Deterministic "linear layer" parameters (stored transposed vs. PyTorch).
    w1 = jax.random.normal(k1, (H, I), dtype=jnp.float32) * 0.05
    b1 = jax.random.normal(kb1, (I,), dtype=jnp.float32) * 0.05
    w2 = jax.random.normal(k2, (I, H), dtype=jnp.float32) * 0.05
    b2 = jax.random.normal(kb2, (H,), dtype=jnp.float32) * 0.05

    # Fast path: tanh-approximate GELU (EUP), compared against matching reference.
    y = positionwise_feed_forward(x, w1, b1, w2, b2, approximate_gelu=True)
    jax.block_until_ready(y)
    assert y.shape == (B, S, H)
    y_ref = _reference(x, w1, b1, w2, b2, approximate=True)
    assert jnp.allclose(y, y_ref, atol=1e-4, rtol=1e-4)

    # Exact erf GELU path (matches torch.nn.functional.gelu default semantics).
    y_exact = positionwise_feed_forward(x, w1, b1, w2, b2, approximate_gelu=False)
    jax.block_until_ready(y_exact)
    y_exact_ref = _reference(x, w1, b1, w2, b2, approximate=False)
    assert jnp.allclose(y_exact, y_exact_ref, atol=1e-4, rtol=1e-4)

    # Exercise the I-tiled accumulator fallback (forced) with 2 intermediate chunks.
    I2 = 256
    k3, kb3, k4, kb4 = jax.random.split(jax.random.PRNGKey(1), 4)
    w1b = jax.random.normal(k3, (H, I2), dtype=jnp.float32) * 0.05
    b1b = jax.random.normal(kb3, (I2,), dtype=jnp.float32) * 0.05
    w2b = jax.random.normal(k4, (I2, H), dtype=jnp.float32) * 0.05
    b2b = jax.random.normal(kb4, (H,), dtype=jnp.float32) * 0.05
    y2 = positionwise_feed_forward(x, w1b, b1b, w2b, b2b,
                                   approximate_gelu=True, force_ti=128)
    jax.block_until_ready(y2)
    y2_ref = _reference(x, w1b, b1b, w2b, b2b, approximate=True)
    assert jnp.allclose(y2, y2_ref, atol=1e-4, rtol=1e-4)

    print("KERNEL_OK")
</pallas_src>

<mosaic_0001>
module attributes {stable_mosaic.version = 11 : i64} {
  func.func @_ffn_kernel_resident(%arg0: i32, %arg1: memref<16x128xf32, #tpu.memory_space<vmem>>, %arg2: memref<128x128xf32, #tpu.memory_space<vmem>>, %arg3: memref<1x128xf32, #tpu.memory_space<vmem>>, %arg4: memref<128x128xf32, #tpu.memory_space<vmem>>, %arg5: memref<1x128xf32, #tpu.memory_space<vmem>>, %arg6: memref<16x128xf32, #tpu.memory_space<vmem>>) attributes {dimension_semantics = [#tpu.dimension_semantics<parallel>], iteration_bounds = array<i64: 1>, scalar_prefetch = 0 : i64, scratch_operands = 0 : i64, tpu.core_type = #tpu.core_type<tc>, window_params = [{transform_indices = @transform_0, window_bounds = array<i64: 16, 128>}, {pipeline_mode = #tpu.pipeline_mode<synchronous>, transform_indices = @transform_1, window_bounds = array<i64: 128, 128>}, {pipeline_mode = #tpu.pipeline_mode<synchronous>, transform_indices = @transform_2, window_bounds = array<i64: 1, 128>}, {pipeline_mode = #tpu.pipeline_mode<synchronous>, transform_indices = @transform_3, window_bounds = array<i64: 128, 128>}, {pipeline_mode = #tpu.pipeline_mode<synchronous>, transform_indices = @transform_4, window_bounds = array<i64: 1, 128>}, {transform_indices = @transform_5, window_bounds = array<i64: 16, 128>}]} {
    %c0 = arith.constant 0 : index
    %c0_0 = arith.constant 0 : index
    %0 = vector.load %arg1[%c0, %c0_0] : memref<16x128xf32, #tpu.memory_space<vmem>>, vector<16x128xf32>
    %c0_1 = arith.constant 0 : index
    %c0_2 = arith.constant 0 : index
    %1 = vector.load %arg2[%c0_1, %c0_2] : memref<128x128xf32, #tpu.memory_space<vmem>>, vector<128x128xf32>
    %cst = arith.constant dense<0.000000e+00> : vector<16x128xf32>
    %2 = tpu.matmul %0, %1, %cst {dimension_numbers = #tpu.dot_dimension_numbers<[1], [0], [0], [1], [0, 0, 1, 1], [], []>} : vector<16x128xf32>, vector<128x128xf32>, vector<16x128xf32> -> vector<16x128xf32>
    %c0_3 = arith.constant 0 : index
    %c0_4 = arith.constant 0 : index
    %3 = vector.load %arg3[%c0_3, %c0_4] : memref<1x128xf32, #tpu.memory_space<vmem>>, vector<1x128xf32>
    %4 = vector.broadcast %3 : vector<1x128xf32> to vector<16x128xf32>
    %5 = arith.addf %2, %4 : vector<16x128xf32>
    %6 = arith.mulf %5, %5 : vector<16x128xf32>
    %7 = arith.mulf %5, %6 : vector<16x128xf32>
    %cst_5 = arith.constant 4.471500e-02 : f32
    %8 = vector.broadcast %cst_5 : f32 to vector<16x128xf32>
    %9 = arith.mulf %8, %7 : vector<16x128xf32>
    %10 = arith.addf %5, %9 : vector<16x128xf32>
    %cst_6 = arith.constant 0.797884583 : f32
    %11 = vector.broadcast %cst_6 : f32 to vector<16x128xf32>
    %12 = arith.mulf %11, %10 : vector<16x128xf32>
    %13 = math.tanh %12 : vector<16x128xf32>
    %cst_7 = arith.constant 1.000000e+00 : f32
    %14 = vector.broadcast %cst_7 : f32 to vector<16x128xf32>
    %15 = arith.addf %14, %13 : vector<16x128xf32>
    %cst_8 = arith.constant 5.000000e-01 : f32
    %16 = vector.broadcast %cst_8 : f32 to vector<16x128xf32>
    %17 = arith.mulf %16, %15 : vector<16x128xf32>
    %18 = arith.mulf %5, %17 : vector<16x128xf32>
    %c0_9 = arith.constant 0 : index
    %c0_10 = arith.constant 0 : index
    %19 = vector.load %arg4[%c0_9, %c0_10] : memref<128x128xf32, #tpu.memory_space<vmem>>, vector<128x128xf32>
    %cst_11 = arith.constant dense<0.000000e+00> : vector<16x128xf32>
    %20 = tpu.matmul %18, %19, %cst_11 {dimension_numbers = #tpu.dot_dimension_numbers<[1], [0], [0], [1], [0, 0, 1, 1], [], []>} : vector<16x128xf32>, vector<128x128xf32>, vector<16x128xf32> -> vector<16x128xf32>
    %c0_12 = arith.constant 0 : index
    %c0_13 = arith.constant 0 : index
    %21 = vector.load %arg5[%c0_12, %c0_13] : memref<1x128xf32, #tpu.memory_space<vmem>>, vector<1x128xf32>
    %22 = vector.broadcast %21 : vector<1x128xf32> to vector<16x128xf32>
    %23 = arith.addf %20, %22 : vector<16x128xf32>
    %c0_14 = arith.constant 0 : index
    %c0_15 = arith.constant 0 : index
    %24 = vector.load %arg6[%c0_14, %c0_15] : memref<16x128xf32, #tpu.memory_space<vmem>>, vector<16x128xf32>
    tpu.vector_store %arg6[%c0_14, %c0_15], %23 {strides = array<i32>} : memref<16x128xf32, #tpu.memory_space<vmem>>, vector<16x128xf32>,
    return
  }
  func.func @transform_0(%arg0: i32) -> (i32, i32) {
    %c0_i32 = arith.constant 0 : i32
    %c0_i32_0 = arith.constant 0 : i32
    return %arg0, %c0_i32 : i32, i32
  }
  func.func @transform_1(%arg0: i32) -> (i32, i32) {
    %c0_i32 = arith.constant 0 : i32
    %c0_i32_0 = arith.constant 0 : i32
    %c0_i32_1 = arith.constant 0 : i32
    return %c0_i32, %c0_i32_0 : i32, i32
  }
  func.func @transform_2(%arg0: i32) -> (i32, i32) {
    %c0_i32 = arith.constant 0 : i32
    %c0_i32_0 = arith.constant 0 : i32
    %c0_i32_1 = arith.constant 0 : i32
    return %c0_i32, %c0_i32_0 : i32, i32
  }
  func.func @transform_3(%arg0: i32) -> (i32, i32) {
    %c0_i32 = arith.constant 0 : i32
    %c0_i32_0 = arith.constant 0 : i32
    %c0_i32_1 = arith.constant 0 : i32
    return %c0_i32, %c0_i32_0 : i32, i32
  }
  func.func @transform_4(%arg0: i32) -> (i32, i32) {
    %c0_i32 = arith.constant 0 : i32
    %c0_i32_0 = arith.constant 0 : i32
    %c0_i32_1 = arith.constant 0 : i32
    return %c0_i32, %c0_i32_0 : i32, i32
  }
  func.func @transform_5(%arg0: i32) -> (i32, i32) {
    %c0_i32 = arith.constant 0 : i32
    %c0_i32_0 = arith.constant 0 : i32
    return %arg0, %c0_i32 : i32, i32
  }
}

</mosaic_0001>

<bundles_post_ra>
// kernel: tpu_custom_call.1
= control target key start
LH: loop header
LB: loop body
LE: loop exit
PB: predicated region body
PF: predicated region fallthrough
CT: control target
= control target key end

     0   :  { %10 = vsyncpa [#allocation3], 0  ;;  %s568_s0 = inlined_call_operand.hbm [shape: f32[16,128], index: 0, kind: input, shape index: {}]   ;;  %s569_s1 = inlined_call_operand.hbm [shape: f32[128,128], index: 1, kind: input, shape index: {}]   ;;  %s570_s2 = inlined_call_operand.vmem [shape: f32[1,128], index: 2, kind: input, shape index: {}]   ;;  %s571_s3 = inlined_call_operand.hbm [shape: f32[128,128], index: 3, kind: input, shape index: {}]   ;;  %s572_s4 = inlined_call_operand.vmem [shape: f32[1,128], index: 4, kind: input, shape index: {}]   ;;  %s573_s5 = inlined_call_operand.hbm [shape: f32[16,128], index: 5, kind: output, shape index: {}]  }
   0x1   :  { %11 = vsyncpa [#allocation6], 0 }
   0x2   :  { %12 = vsyncpa [#allocation4], 0  ;;  %s502_s18 = smov [#allocation5]   ;;  %s503_s20 = smov [#allocation2]  }
   0x3   :  { %s30_s19 = sshll.u32 %s502_s18, 4  ;;  %s18_s21 = sshll.u32 %s503_s20, 4  ;;  %s31_s19 = int_to_ptr.vmem [resolvable:$true] %s30_s19  ;;  %s19_s21 = int_to_ptr.vmem [resolvable:$true] %s18_s21 }
   0x4   :  { %s424_s22 = scalar_lea.vmem %s31_s19, 2048  ;;  %p429_p1 = scmp.lt.s32.totalorder %s31_s19, %s31_s19 }
   0x5   :  { %p425_p0 = scmp.ne.s32.totalorder %s31_s19, %s424_s22  ;;  %p430_p2 = scmp.lt.s32.totalorder %s424_s22, %s424_s22 }
   0x7   :  { %p431_p3 = por %p430_p2, %p429_p1 }
   0x9   :  { %p432_p4 = pnand %p431_p3, %p425_p0 }
   0xb   :  { %435 = shalt.err (!%p432_p4)
}
   0xc   :  { %s504_s23 = smov 128   ;;  %s505_s24 = smov 8  }
   0xd   :  { %36 = dma.hbm_to_vmem [thread:$0]  %s569_s1, 2048, %s31_s19, [#allocation6], %s504_s23, %s504_s23, %s505_s24  }
   0xe   :  { %s444_s27 = scalar_lea.vmem %s19_s21, 256  ;;  %p449_p6 = scmp.lt.s32.totalorder %s19_s21, %s19_s21 }
   0xf   :  { %p445_p5 = scmp.ne.s32.totalorder %s19_s21, %s444_s27  ;;  %p450_p7 = scmp.lt.s32.totalorder %s444_s27, %s444_s27 }
  0x11   :  { %p451_p8 = por %p450_p7, %p449_p6 }
  0x13   :  { %p452_p9 = pnand %p451_p8, %p445_p5 }
  0x15   :  { %455 = shalt.err (!%p452_p9)
}
  0x16   :  { %24 = dma.hbm_to_vmem [thread:$0]  %s568_s0, 256, %s19_s21, [#allocation3], %s504_s23, %s504_s23, %s505_s24  }
  0x17   :  { %s506_s30 = smov [#allocation7]  }
  0x18   :  { %s44_s6 = sshll.u32 %s506_s30, 4  ;;  %s45_s6 = int_to_ptr.vmem [resolvable:$true] %s44_s6 }
  0x19   :  { %s464_s7 = scalar_lea.vmem %s45_s6, 2048  ;;  %p469_p11 = scmp.lt.s32.totalorder %s45_s6, %s45_s6 }
  0x1a   :  { %p465_p10 = scmp.ne.s32.totalorder %s45_s6, %s464_s7  ;;  %p470_p12 = scmp.lt.s32.totalorder %s464_s7, %s464_s7 }
  0x1c   :  { %p471_p13 = por %p470_p12, %p469_p11 }
  0x1e   :  { %p472_p0 = pnand %p471_p13, %p465_p10 }
  0x20   :  { %475 = shalt.err (!%p472_p0)
}
  0x21   :  { %50 = dma.hbm_to_vmem [thread:$0]  %s571_s3, 2048, %s45_s6, [#allocation6], %s504_s23, %s504_s23, %s505_s24  }
  0x22   :  { %496 = dma.done.wait [#allocation3], 256  }
  0x23   :  { %497 = vsyncadd [#allocation3], 4294967040 }
  0x24   :  { %498 = dma.done.wait [#allocation6], 4096  }
  0x25   :  { %499 = vsyncadd [#allocation6], 4294963200  ;;  %v79_v0 = vld [vmem:[#allocation5 + $0x78] sm:$0xff]  ;;  %v78_v1 = vld [vmem:[#allocation5 + $0x70] sm:$0xff]  ;;  %s507_s10 = smov [#allocation8]  }
  0x26   :  { %336 = vmatprep.subr.mxu0 %v79_v0  ;;  %v77_v2 = vld [vmem:[#allocation5 + $0x68] sm:$0xff]  ;;  %v76_v3 = vld [vmem:[#allocation5 + $0x60] sm:$0xff]  ;;  %v62_v4 = vld [vmem:[#allocation2] sm:$0xff]  ;;  %s285_s11 = sshll.u32 %s507_s10, 4  ;;  %s286_s11 = int_to_ptr.vmem [resolvable:$true] %s285_s11 }
  0x27   :  { %337 = vmatpush3.msra.mxu0 %v79_v0  ;;  %v75_v5 = vld [vmem:[#allocation5 + $0x58] sm:$0xff]  ;;  %368 = vmatprep.mubr.f32.mxu0 %v62_v4  ;;  %v74_v6 = vld [vmem:[#allocation5 + $0x50] sm:$0xff]  ;;  %v73_v7 = vld [vmem:[#allocation5 + $0x48] sm:$0xff]  ;;  %s476_s12 = scalar_lea.vmem %s286_s11, 256  ;;  %p481_p2 = scmp.lt.s32.totalorder %s286_s11, %s286_s11 }
  0x28   :  { %338 = vmatprep.subr.mxu0 %v78_v1  ;;  %v72_v8 = vld [vmem:[#allocation5 + $0x40] sm:$0xff]  ;;  %v71_v9 = vld [vmem:[#allocation5 + $0x38] sm:$0xff]  ;;  %v70_v10 = vld [vmem:[#allocation5 + $0x30] sm:$0xff]  ;;  %p477_p1 = scmp.ne.s32.totalorder %s286_s11, %s476_s12  ;;  %p482_p3 = scmp.lt.s32.totalorder %s476_s12, %s476_s12 }
  0x29   :  { %339 = vmatpush3.msra.mxu0 %v78_v1  ;;  %v69_v11 = vld [vmem:[#allocation5 + $0x28] sm:$0xff]  ;;  %v68_v12 = vld [vmem:[#allocation5 + $0x20] sm:$0xff]  ;;  %v67_v13 = vld [vmem:[#allocation5 + $0x18] sm:$0xff] }
  0x2a   :  { %340 = vmatprep.subr.mxu0 %v77_v2  ;;  %v66_v14 = vld [vmem:[#allocation5 + $0x10] sm:$0xff]  ;;  %v65_v15 = vld [vmem:[#allocation5 + $0x8] sm:$0xff]  ;;  %v64_v16 = vld [vmem:[#allocation5] sm:$0xff]  ;;  %p483_p4 = por %p482_p3, %p481_p2 }
  0x2b   :  { %341 = vmatpush3.msra.mxu0 %v77_v2  ;;  %v63_v17 = vld [vmem:[#allocation2 + $0x8] sm:$0xff]  ;;  %v194_v19 = vld [vmem:[#allocation7 + $0x70] sm:$0xff]  ;;  %v193_v20 = vld [vmem:[#allocation7 + $0x68] sm:$0xff] }
  0x2c   :  { %342 = vmatprep.subr.mxu0 %v76_v3  ;;  %v195_v18 = vld [vmem:[#allocation7 + $0x78] sm:$0xff]  ;;  %v192_v21 = vld [vmem:[#allocation7 + $0x60] sm:$0xff]  ;;  %v190_v23 = vld [vmem:[#allocation7 + $0x50] sm:$0xff]  ;;  %p484_p5 = pnand %p483_p4, %p477_p1 }
  0x2d   :  { %343 = vmatpush3.msra.mxu0 %v76_v3  ;;  %371 = vmatprep.subr.mxu1 %v195_v18  ;;  %v191_v22 = vld [vmem:[#allocation7 + $0x58] sm:$0xff]  ;;  %v189_v24 = vld [vmem:[#allocation7 + $0x48] sm:$0xff]  ;;  %v188_v25 = vld [vmem:[#allocation7 + $0x40] sm:$0xff] }
  0x2e   :  { %344 = vmatprep.subr.mxu0 %v75_v5  ;;  %372 = vmatpush3.msra.mxu1 %v195_v18  ;;  %v187_v26 = vld [vmem:[#allocation7 + $0x38] sm:$0xff]  ;;  %v186_v27 = vld [vmem:[#allocation7 + $0x30] sm:$0xff]  ;;  %v185_v28 = vld [vmem:[#allocation7 + $0x28] sm:$0xff] }
  0x2f   :  { %345 = vmatpush3.msra.mxu0 %v75_v5  ;;  %373 = vmatprep.subr.mxu1 %v194_v19  ;;  %v184_v29 = vld [vmem:[#allocation7 + $0x20] sm:$0xff]  ;;  %v183_v30 = vld [vmem:[#allocation7 + $0x18] sm:$0xff]  ;;  %v182_v31 = vld [vmem:[#allocation7 + $0x10] sm:$0xff] }
  0x30   :  { %346 = vmatprep.subr.mxu0 %v74_v6  ;;  %374 = vmatpush3.msra.mxu1 %v194_v19  ;;  %v181_v32 = vld [vmem:[#allocation7 + $0x8] sm:$0xff]  ;;  %v180_v33 = vld [vmem:[#allocation7] sm:$0xff]  ;;  %v298_v34 = vld [vmem:[%s570_s2] ss:$0 sm:$0xff] }
  0x31   :  { %347 = vmatpush3.msra.mxu0 %v74_v6  ;;  %375 = vmatprep.subr.mxu1 %v193_v20  ;;  %v299_v57 = vld [vmem:[%s572_s4] ss:$0 sm:$0xff] }
  0x32   :  { %348 = vmatprep.subr.mxu0 %v73_v7  ;;  %376 = vmatpush3.msra.mxu1 %v193_v20 }
  0x33   :  { %349 = vmatpush3.msra.mxu0 %v73_v7  ;;  %377 = vmatprep.subr.mxu1 %v192_v21 }
  0x34   :  { %350 = vmatprep.subr.mxu0 %v72_v8  ;;  %378 = vmatpush3.msra.mxu1 %v192_v21 }
  0x35   :  { %351 = vmatpush3.msra.mxu0 %v72_v8  ;;  %379 = vmatprep.subr.mxu1 %v191_v22 }
  0x36   :  { %352 = vmatprep.subr.mxu0 %v71_v9  ;;  %380 = vmatpush3.msra.mxu1 %v191_v22 }
  0x37   :  { %353 = vmatpush3.msra.mxu0 %v71_v9  ;;  %381 = vmatprep.subr.mxu1 %v190_v23 }
  0x38   :  { %354 = vmatprep.subr.mxu0 %v70_v10  ;;  %382 = vmatpush3.msra.mxu1 %v190_v23 }
  0x39   :  { %355 = vmatpush3.msra.mxu0 %v70_v10  ;;  %383 = vmatprep.subr.mxu1 %v189_v24 }
  0x3a   :  { %356 = vmatprep.subr.mxu0 %v69_v11  ;;  %384 = vmatpush3.msra.mxu1 %v189_v24 }
  0x3b   :  { %357 = vmatpush3.msra.mxu0 %v69_v11  ;;  %385 = vmatprep.subr.mxu1 %v188_v25 }
  0x3c   :  { %358 = vmatprep.subr.mxu0 %v68_v12  ;;  %386 = vmatpush3.msra.mxu1 %v188_v25 }
  0x3d   :  { %359 = vmatpush3.msra.mxu0 %v68_v12  ;;  %387 = vmatprep.subr.mxu1 %v187_v26 }
  0x3e   :  { %360 = vmatprep.subr.mxu0 %v67_v13  ;;  %388 = vmatpush3.msra.mxu1 %v187_v26 }
  0x3f   :  { %361 = vmatpush3.msra.mxu0 %v67_v13  ;;  %389 = vmatprep.subr.mxu1 %v186_v27 }
  0x40   :  { %362 = vmatprep.subr.mxu0 %v66_v14  ;;  %390 = vmatpush3.msra.mxu1 %v186_v27 }
  0x41   :  { %363 = vmatpush3.msra.mxu0 %v66_v14  ;;  %391 = vmatprep.subr.mxu1 %v185_v28 }
  0x42   :  { %364 = vmatprep.subr.mxu0 %v65_v15  ;;  %392 = vmatpush3.msra.mxu1 %v185_v28 }
  0x43   :  { %365 = vmatpush3.msra.mxu0 %v65_v15  ;;  %393 = vmatprep.subr.mxu1 %v184_v29 }
  0x44   :  { %366 = vmatprep.subr.mxu0 %v64_v16  ;;  %394 = vmatpush3.msra.mxu1 %v184_v29 }
  0x45   :  { %367 = vmatpush3.msra.mxu0 %v64_v16  ;;  %395 = vmatprep.subr.mxu1 %v183_v30 }
  0x46   :  { %369 = vmatmul.mubr.f32.vlgmr.msra.gmra.mxu0 %v63_v17  ;;  %396 = vmatpush3.msra.mxu1 %v183_v30 }
  0x47   :  { %397 = vmatprep.subr.mxu1 %v182_v31 }
  0x48   :  { %398 = vmatpush3.msra.mxu1 %v182_v31 }
  0x49   :  { %399 = vmatprep.subr.mxu1 %v181_v32 }
  0x4a   :  { %400 = vmatpush3.msra.mxu1 %v181_v32 }
  0x4b   :  { %401 = vmatprep.subr.mxu1 %v180_v33 }
  0x4c   :  { %402 = vmatpush3.msra.mxu1 %v180_v33 }
 0x106   :  { %v370_v35 = vpop.f32.mrf.mxu0 }
 0x107   :  { %v159_v36 = vadd.f32 %v370_v35, %v298_v34 }
 0x108   :  { %v153_v37 = vpop.f32.mrf.mxu0 }
 0x109   :  { %v163_v38 = vmul.f32 %v159_v36, %v159_v36  ;;  %v154_v39 = vadd.f32 %v298_v34, %v153_v37 }
 0x10b   :  { %v165_v40 = vmul.f32 %v163_v38, %v159_v36  ;;  %v162_v41 = vmul.f32 %v154_v39, %v154_v39 }
 0x10d   :  { %v167_v42 = vmul.f32 0.044715, %v165_v40  ;;  %v164_v43 = vmul.f32 %v162_v41, %v154_v39 }
 0x10f   :  { %v169_v44 = vadd.f32 %v167_v42, %v159_v36  ;;  %v166_v45 = vmul.f32 0.044715, %v164_v43 }
 0x111   :  { %v171_v46 = vmul.f32 0.7978846, %v169_v44  ;;  %v168_v47 = vadd.f32 %v166_v45, %v154_v39 }
 0x113   :  { %412 = vtanh.f32 %v171_v46  ;;  %v170_v48 = vmul.f32 0.7978846, %v168_v47 }
 0x115   :  { %414 = vtanh.f32 %v170_v48 }
 0x120   :  { %v413_v49 = vpop.eup %412 }
 0x121   :  { %v175_v50 = vadd.f32 1.0, %v413_v49 }
 0x122   :  { %v415_v51 = vpop.eup %414 }
 0x123   :  { %v174_v52 = vadd.f32 1.0, %v415_v51  ;;  %v177_v53 = vmul.f32 0.5, %v175_v50 }
 0x125   :  { %v176_v54 = vmul.f32 0.5, %v174_v52  ;;  %v179_v56 = vmul.f32 %v177_v53, %v159_v36 }
 0x127   :  { %v178_v55 = vmul.f32 %v176_v54, %v154_v39 }
 0x129   :  { %403 = vmatprep.mubr.f32.mxu1 %v178_v55 }
 0x12a   :  { %404 = vmatmul.mubr.f32.vlgmr.msra.gmra.mxu1 %v179_v56 }
 0x1ea   :  { %v405_v58 = vpop.f32.mrf.mxu1 }
 0x1eb   :  { %v275_v59 = vadd.f32 %v405_v58, %v299_v57 }
 0x1ec   :  { %v269_v60 = vpop.f32.mrf.mxu1 }
 0x1ed   :  { %279 = vst [vmem:[#allocation8 + $0x8] sm:$0xff] %v275_v59  ;;  %v270_v61 = vadd.f32 %v299_v57, %v269_v60 }
 0x1ef   :  { %278 = vst [vmem:[#allocation8] sm:$0xff] %v270_v61 }
 0x1f0   :  { %487 = shalt.err (!%p484_p5)
}
 0x1f1   :  { %291 = dma.vmem_to_hbm [thread:$0]  %s286_s11, 256, %s573_s5, [#allocation4], %s504_s23, %s504_s23, %s505_s24  }
 0x1f2   :  { %500 = dma.done.wait [#allocation4], 256  }
 0x1f3   :  { %501 = vsyncadd [#allocation4], 4294967040 }
 0x1f4   :  { %295 = vsyncpa [#allocation3], 1 }
 0x1f5   :  { %296 = vsyncpa [#allocation6], 1 }
 0x1f6   :  { %297 = vsyncpa [#allocation4], 1 }

</bundles_post_ra>
